<compile_context>
chip_gen: v7x
topology: tpu7x:2x2x1
jax: 0.10.0
libtpu: 0.0.40
codegen_flags: <defaults>
</compile_context>

<pallas_src>
import functools
import math

import jax
import jax.numpy as jnp
from jax import lax
from jax.experimental import pallas as pl
from jax.experimental.pallas import tpu as pltpu


# ---------------------------------------------------------------------------
# Helpers
# ---------------------------------------------------------------------------
def _pick_tile(dim, target, align):
    """Largest tile <= target that divides `dim` and is a multiple of `align`.

    Falls back to the full dimension (always a legal TPU block size)."""
    if dim <= target:
        return dim
    t = (target // align) * align
    while t >= align:
        if dim % t == 0:
            return t
        t -= align
    return dim


# ---------------------------------------------------------------------------
# Kernel 1: tiled matmul + bias  (y = x @ W + b)
# ---------------------------------------------------------------------------
def _linear_kernel(x_ref, w_ref, b_ref, o_ref, acc_ref):
    k = pl.program_id(2)

    @pl.when(k == 0)
    def _():
        acc_ref[...] = jnp.zeros_like(acc_ref)

    # Operands stay in their input dtype (bf16-friendly); accumulate in f32.
    acc_ref[...] += jnp.dot(x_ref[...], w_ref[...],
                            preferred_element_type=jnp.float32)

    @pl.when(k == pl.num_programs(2) - 1)
    def _():
        o_ref[...] = (acc_ref[...] + b_ref[...].astype(jnp.float32)
                      ).astype(o_ref.dtype)


def _linear(x2d, w, b):
    """x2d: [M, K], w: [K, N] (already transposed from torch [out,in]), b: [1, N]."""
    M, K = x2d.shape
    _, N = w.shape

    tm = _pick_tile(M, 256, 8)
    tn = _pick_tile(N, 256, 128)   # lane-dense output tiles
    tk = _pick_tile(K, 512, 128)

    grid = (M // tm, N // tn, K // tk)

    return pl.pallas_call(
        _linear_kernel,
        out_shape=jax.ShapeDtypeStruct((M, N), x2d.dtype),
        grid=grid,
        in_specs=[
            pl.BlockSpec((tm, tk), lambda i, j, k: (i, k)),
            pl.BlockSpec((tk, tn), lambda i, j, k: (k, j)),
            pl.BlockSpec((1, tn), lambda i, j, k: (0, j)),
        ],
        out_specs=pl.BlockSpec((tm, tn), lambda i, j, k: (i, j)),
        scratch_shapes=[pltpu.VMEM((tm, tn), jnp.float32)],
        compiler_params=pltpu.CompilerParams(
            dimension_semantics=("parallel", "parallel", "arbitrary"),
            vmem_limit_bytes=32 * 1024 * 1024),
        cost_estimate=pl.CostEstimate(
            flops=2 * M * N * K,
            transcendentals=0,
            bytes_accessed=(M * K + K * N + M * N + N) * x2d.dtype.itemsize),
    )(x2d, w, b)


# ---------------------------------------------------------------------------
# Kernel 2: flash-style attention over (B, H, q_tile, kv_tile)
# ---------------------------------------------------------------------------
def _flash_attn_kernel(q_ref, k_ref, v_ref, o_ref, m_sc, l_sc, acc_sc, *, scale):
    kv = pl.program_id(3)

    @pl.when(kv == 0)
    def _():
        m_sc[...] = jnp.full_like(m_sc, -jnp.inf)
        l_sc[...] = jnp.zeros_like(l_sc)
        acc_sc[...] = jnp.zeros_like(acc_sc)

    q = q_ref[...]                      # (tq, d_k), input dtype
    k = k_ref[...]                      # (tkv, d_k)
    v = v_ref[...]                      # (tkv, d_k)

    # scores = q @ k^T (contraction over d_k), f32 accumulation on the MXU.
    s = lax.dot_general(q, k, (((1,), (1,)), ((), ())),
                        preferred_element_type=jnp.float32) * scale   # (tq, tkv)

    m_prev = m_sc[...]
    m_new = jnp.maximum(m_prev, jnp.max(s, axis=-1, keepdims=True))
    alpha = jnp.exp(m_prev - m_new)
    p = jnp.exp(s - m_new)

    l_sc[...] = alpha * l_sc[...] + jnp.sum(p, axis=-1, keepdims=True)
    acc_sc[...] = alpha * acc_sc[...] + jnp.dot(
        p.astype(v.dtype), v, preferred_element_type=jnp.float32)
    m_sc[...] = m_new

    @pl.when(kv == pl.num_programs(3) - 1)
    def _():
        inv_l = pl.reciprocal(l_sc[...], approx=True)   # EUP slot, off the VALU path
        o_ref[...] = (acc_sc[...] * inv_l).astype(o_ref.dtype)


def _flash_attention(q, k, v):
    """q, k, v: [B, H, S, d_k]  ->  [B, H, S, d_k]."""
    B, H, S, d_k = q.shape
    tq = _pick_tile(S, 256, 8)
    tkv = _pick_tile(S, 256, 8)
    scale = 1.0 / math.sqrt(d_k)

    grid = (B, H, S // tq, S // tkv)
    kernel = functools.partial(_flash_attn_kernel, scale=scale)

    return pl.pallas_call(
        kernel,
        out_shape=jax.ShapeDtypeStruct((B, H, S, d_k), q.dtype),
        grid=grid,
        in_specs=[
            pl.BlockSpec((None, None, tq, d_k), lambda b, h, qi, ki: (b, h, qi, 0)),
            pl.BlockSpec((None, None, tkv, d_k), lambda b, h, qi, ki: (b, h, ki, 0)),
            pl.BlockSpec((None, None, tkv, d_k), lambda b, h, qi, ki: (b, h, ki, 0)),
        ],
        out_specs=pl.BlockSpec((None, None, tq, d_k),
                               lambda b, h, qi, ki: (b, h, qi, 0)),
        scratch_shapes=[
            pltpu.VMEM((tq, 1), jnp.float32),     # running max
            pltpu.VMEM((tq, 1), jnp.float32),     # running denom
            pltpu.VMEM((tq, d_k), jnp.float32),   # output accumulator
        ],
        compiler_params=pltpu.CompilerParams(
            dimension_semantics=("parallel", "parallel", "parallel", "arbitrary"),
            vmem_limit_bytes=32 * 1024 * 1024),
        cost_estimate=pl.CostEstimate(
            flops=4 * B * H * S * S * d_k,
            transcendentals=B * H * S * S,
            bytes_accessed=4 * B * H * S * d_k * q.dtype.itemsize),
    )(q, k, v)


# ---------------------------------------------------------------------------
# Full forward pass (matches the PyTorch module semantics)
# ---------------------------------------------------------------------------
def multi_head_attention(x, params, *, num_heads):
    """x: [B, S, d_model].  params: pre-transposed weights [in,out], biases [1,out]."""
    B, S, D = x.shape
    assert D % num_heads == 0, "d_model must be divisible by num_heads"
    d_k = D // num_heads

    # Packed QKV projection: one lane-dense [B*S, 3D] matmul.
    w_qkv = jnp.concatenate([params["wq"], params["wk"], params["wv"]], axis=1)
    b_qkv = jnp.concatenate([params["bq"], params["bk"], params["bv"]], axis=1)
    x2d = x.reshape(B * S, D)
    qkv = _linear(x2d, w_qkv, b_qkv)                       # (B*S, 3D)

    def split_heads(t2d):
        return t2d.reshape(B, S, num_heads, d_k).transpose(0, 2, 1, 3)  # (B,H,S,d_k)

    q = split_heads(qkv[:, :D])
    k = split_heads(qkv[:, D:2 * D])
    v = split_heads(qkv[:, 2 * D:])

    attn = _flash_attention(q, k, v)                       # (B, H, S, d_k)

    # Head "concat" is just a layout transpose feeding a lane-dense matmul.
    attn2d = attn.transpose(0, 2, 1, 3).reshape(B * S, D)
    out = _linear(attn2d, params["wo"], params["bo"])      # (B*S, D)
    return out.reshape(B, S, D)


# ---------------------------------------------------------------------------
# Plain-JAX reference (mirrors the PyTorch forward)
# ---------------------------------------------------------------------------
def _reference_mha(x, params, *, num_heads):
    B, S, D = x.shape
    d_k = D // num_heads

    def proj(w, b):
        return jnp.einsum("bsd,de->bse", x, w, precision="highest") + b[0]

    q = proj(params["wq"], params["bq"])
    k = proj(params["wk"], params["bk"])
    v = proj(params["wv"], params["bv"])

    def split(t):
        return t.reshape(B, S, num_heads, d_k).transpose(0, 2, 1, 3)

    qh, kh, vh = split(q), split(k), split(v)
    scores = jnp.einsum("bhqd,bhkd->bhqk", qh, kh,
                        precision="highest") / jnp.sqrt(jnp.float32(d_k))
    attn = jax.nn.softmax(scores, axis=-1)
    out = jnp.einsum("bhqk,bhkd->bhqd", attn, vh, precision="highest")
    out = out.transpose(0, 2, 1, 3).reshape(B, S, D)
    return jnp.einsum("bsd,de->bse", out, params["wo"],
                      precision="highest") + params["bo"][0]


# ---------------------------------------------------------------------------
# Self-test
# ---------------------------------------------------------------------------
if __name__ == "__main__":
    def make_params(key, D, scale):
        ks = jax.random.split(key, 8)
        # torch Linear weight is [out, in]; generate [in, out] directly (x @ W).
        def w(k): return jax.random.normal(k, (D, D), jnp.float32) * scale
        def b(k): return jax.random.normal(k, (1, D), jnp.float32) * scale
        return {"wq": w(ks[0]), "bq": b(ks[1]),
                "wk": w(ks[2]), "bk": b(ks[3]),
                "wv": w(ks[4]), "bv": b(ks[5]),
                "wo": w(ks[6]), "bo": b(ks[7])}

    key = jax.random.PRNGKey(0)
    k1, k2, k3, k4 = jax.random.split(key, 4)

    # --- Test 1: small shapes implied by the module (B=2, S=8, d_model=32, 4 heads)
    B, S, D, H = 2, 8, 32, 4
    params = make_params(k1, D, 0.1)
    x = jax.random.normal(k2, (B, S, D), jnp.float32)

    fwd = jax.jit(functools.partial(multi_head_attention, num_heads=H))
    out = jax.block_until_ready(fwd(x, params))
    ref = _reference_mha(x, params, num_heads=H)
    assert out.shape == (B, S, D)
    assert jnp.allclose(out, ref, atol=2e-3, rtol=2e-3), (
        f"mismatch (test 1): max |diff| = {jnp.max(jnp.abs(out - ref))}")

    # --- Test 2: larger shapes exercising multi-tile q/kv and K-reduction paths.
    B2, S2, D2, H2 = 1, 512, 1024, 8
    params2 = make_params(k3, D2, float(D2) ** -0.5)
    x2 = jax.random.normal(k4, (B2, S2, D2), jnp.float32)

    fwd2 = jax.jit(functools.partial(multi_head_attention, num_heads=H2))
    out2 = jax.block_until_ready(fwd2(x2, params2))
    ref2 = _reference_mha(x2, params2, num_heads=H2)
    assert out2.shape == (B2, S2, D2)
    assert jnp.allclose(out2, ref2, atol=1e-2, rtol=1e-2), (
        f"mismatch (test 2): max |diff| = {jnp.max(jnp.abs(out2 - ref2))}")

    # TODO(synk): torch.nn-style attention masks / dropout are not part of this
    # module's forward and are therefore not implemented.
    print("KERNEL_OK")
</pallas_src>

<mosaic_0001>
module attributes {stable_mosaic.version = 11 : i64} {
  func.func @_linear_kernel(%arg0: i32, %arg1: i32, %arg2: i32, %arg3: memref<16x32xf32, #tpu.memory_space<vmem>>, %arg4: memref<32x96xf32, #tpu.memory_space<vmem>>, %arg5: memref<1x96xf32, #tpu.memory_space<vmem>>, %arg6: memref<16x96xf32, #tpu.memory_space<vmem>>, %arg7: memref<16x96xf32, #tpu.memory_space<vmem>>) attributes {dimension_semantics = [#tpu.dimension_semantics<parallel>, #tpu.dimension_semantics<parallel>, #tpu.dimension_semantics<arbitrary>], iteration_bounds = array<i64: 1, 1, 1>, scalar_prefetch = 0 : i64, scratch_operands = 1 : i64, tpu.core_type = #tpu.core_type<tc>, window_params = [{transform_indices = @transform_0, window_bounds = array<i64: 16, 32>}, {transform_indices = @transform_1, window_bounds = array<i64: 32, 96>}, {transform_indices = @transform_2, window_bounds = array<i64: 1, 96>}, {transform_indices = @transform_3, window_bounds = array<i64: 16, 96>}]} {
    %c0_i32 = arith.constant 0 : i32
    %0 = arith.cmpi eq, %arg2, %c0_i32 : i32
    %1 = arith.extui %0 : i1 to i32
    %c0_i32_0 = arith.constant 0 : i32
    %2 = arith.cmpi ne, %1, %c0_i32_0 : i32
    scf.if %2 {
      %cst_10 = arith.constant 0.000000e+00 : f32
      %12 = vector.broadcast %cst_10 : f32 to vector<16x96xf32>
      %c0_11 = arith.constant 0 : index
      %c0_12 = arith.constant 0 : index
      %13 = vector.load %arg7[%c0_11, %c0_12] : memref<16x96xf32, #tpu.memory_space<vmem>>, vector<16x96xf32>
      tpu.vector_store %arg7[%c0_11, %c0_12], %12 {strides = array<i32>} : memref<16x96xf32, #tpu.memory_space<vmem>>, vector<16x96xf32>,
    } else {
    }
    %c0 = arith.constant 0 : index
    %c0_1 = arith.constant 0 : index
    %3 = vector.load %arg7[%c0, %c0_1] : memref<16x96xf32, #tpu.memory_space<vmem>>, vector<16x96xf32>
    %c0_2 = arith.constant 0 : index
    %c0_3 = arith.constant 0 : index
    %4 = vector.load %arg3[%c0_2, %c0_3] : memref<16x32xf32, #tpu.memory_space<vmem>>, vector<16x32xf32>
    %c0_4 = arith.constant 0 : index
    %c0_5 = arith.constant 0 : index
    %5 = vector.load %arg4[%c0_4, %c0_5] : memref<32x96xf32, #tpu.memory_space<vmem>>, vector<32x96xf32>
    %cst = arith.constant dense<0.000000e+00> : vector<16x96xf32>
    %6 = tpu.matmul %4, %5, %cst {dimension_numbers = #tpu.dot_dimension_numbers<[1], [0], [0], [1], [0, 0, 1, 1], [], []>} : vector<16x32xf32>, vector<32x96xf32>, vector<16x96xf32> -> vector<16x96xf32>
    %7 = arith.addf %3, %6 : vector<16x96xf32>
    %c0_6 = arith.constant 0 : index
    %c0_7 = arith.constant 0 : index
    %8 = vector.load %arg7[%c0_6, %c0_7] : memref<16x96xf32, #tpu.memory_space<vmem>>, vector<16x96xf32>
    tpu.vector_store %arg7[%c0_6, %c0_7], %7 {strides = array<i32>} : memref<16x96xf32, #tpu.memory_space<vmem>>, vector<16x96xf32>,
    %c0_i32_8 = arith.constant 0 : i32
    %9 = arith.cmpi eq, %arg2, %c0_i32_8 : i32
    %10 = arith.extui %9 : i1 to i32
    %c0_i32_9 = arith.constant 0 : i32
    %11 = arith.cmpi ne, %10, %c0_i32_9 : i32
    scf.if %11 {
      %c0_10 = arith.constant 0 : index
      %c0_11 = arith.constant 0 : index
      %12 = vector.load %arg7[%c0_10, %c0_11] : memref<16x96xf32, #tpu.memory_space<vmem>>, vector<16x96xf32>
      %c0_12 = arith.constant 0 : index
      %c0_13 = arith.constant 0 : index
      %13 = vector.load %arg5[%c0_12, %c0_13] : memref<1x96xf32, #tpu.memory_space<vmem>>, vector<1x96xf32>
      %14 = vector.broadcast %13 : vector<1x96xf32> to vector<16x96xf32>
      %15 = arith.addf %12, %14 : vector<16x96xf32>
      %c0_14 = arith.constant 0 : index
      %c0_15 = arith.constant 0 : index
      %16 = vector.load %arg6[%c0_14, %c0_15] : memref<16x96xf32, #tpu.memory_space<vmem>>, vector<16x96xf32>
      tpu.vector_store %arg6[%c0_14, %c0_15], %15 {strides = array<i32>} : memref<16x96xf32, #tpu.memory_space<vmem>>, vector<16x96xf32>,
    } else {
    }
    return
  }
  func.func @transform_0(%arg0: i32, %arg1: i32, %arg2: i32) -> (i32, i32) {
    %c0_i32 = arith.constant 0 : i32
    return %arg0, %arg2 : i32, i32
  }
  func.func @transform_1(%arg0: i32, %arg1: i32, %arg2: i32) -> (i32, i32) {
    %c0_i32 = arith.constant 0 : i32
    return %arg2, %arg1 : i32, i32
  }
  func.func @transform_2(%arg0: i32, %arg1: i32, %arg2: i32) -> (i32, i32) {
    %c0_i32 = arith.constant 0 : i32
    %c0_i32_0 = arith.constant 0 : i32
    return %c0_i32, %arg1 : i32, i32
  }
  func.func @transform_3(%arg0: i32, %arg1: i32, %arg2: i32) -> (i32, i32) {
    %c0_i32 = arith.constant 0 : i32
    return %arg0, %arg1 : i32, i32
  }
}

module attributes {stable_mosaic.version = 11 : i64} {
  func.func @_flash_attn_kernel(%arg0: i32, %arg1: i32, %arg2: i32, %arg3: i32, %arg4: memref<1x1x8x8xf32, #tpu.memory_space<vmem>>, %arg5: memref<1x1x8x8xf32, #tpu.memory_space<vmem>>, %arg6: memref<1x1x8x8xf32, #tpu.memory_space<vmem>>, %arg7: memref<1x1x8x8xf32, #tpu.memory_space<vmem>>, %arg8: memref<8x1xf32, #tpu.memory_space<vmem>>, %arg9: memref<8x1xf32, #tpu.memory_space<vmem>>, %arg10: memref<8x8xf32, #tpu.memory_space<vmem>>) attributes {dimension_semantics = [#tpu.dimension_semantics<parallel>, #tpu.dimension_semantics<parallel>, #tpu.dimension_semantics<parallel>, #tpu.dimension_semantics<arbitrary>], iteration_bounds = array<i64: 2, 4, 1, 1>, scalar_prefetch = 0 : i64, scratch_operands = 3 : i64, tpu.core_type = #tpu.core_type<tc>, window_params = [{transform_indices = @transform_0, window_bounds = array<i64: 1, 1, 8, 8>}, {transform_indices = @transform_1, window_bounds = array<i64: 1, 1, 8, 8>}, {transform_indices = @transform_2, window_bounds = array<i64: 1, 1, 8, 8>}, {transform_indices = @transform_3, window_bounds = array<i64: 1, 1, 8, 8>}]} {
    %c0_i32 = arith.constant 0 : i32
    %0 = arith.cmpi eq, %arg3, %c0_i32 : i32
    %1 = arith.extui %0 : i1 to i32
    %c0_i32_0 = arith.constant 0 : i32
    %2 = arith.cmpi ne, %1, %c0_i32_0 : i32
    scf.if %2 {
      %cst_30 = arith.constant 0xFF800000 : f32
      %37 = vector.broadcast %cst_30 : f32 to vector<8x1xf32>
      %c0_31 = arith.constant 0 : index
      %c0_32 = arith.constant 0 : index
      %38 = vector.load %arg8[%c0_31, %c0_32] : memref<8x1xf32, #tpu.memory_space<vmem>>, vector<8x1xf32>
      tpu.vector_store %arg8[%c0_31, %c0_32], %37 {strides = array<i32>} : memref<8x1xf32, #tpu.memory_space<vmem>>, vector<8x1xf32>,
      %cst_33 = arith.constant 0.000000e+00 : f32
      %39 = vector.broadcast %cst_33 : f32 to vector<8x1xf32>
      %c0_34 = arith.constant 0 : index
      %c0_35 = arith.constant 0 : index
      %40 = vector.load %arg9[%c0_34, %c0_35] : memref<8x1xf32, #tpu.memory_space<vmem>>, vector<8x1xf32>
      tpu.vector_store %arg9[%c0_34, %c0_35], %39 {strides = array<i32>} : memref<8x1xf32, #tpu.memory_space<vmem>>, vector<8x1xf32>,
      %cst_36 = arith.constant 0.000000e+00 : f32
      %41 = vector.broadcast %cst_36 : f32 to vector<8x8xf32>
      %c0_37 = arith.constant 0 : index
      %c0_38 = arith.constant 0 : index
      %42 = vector.load %arg10[%c0_37, %c0_38] : memref<8x8xf32, #tpu.memory_space<vmem>>, vector<8x8xf32>
      tpu.vector_store %arg10[%c0_37, %c0_38], %41 {strides = array<i32>} : memref<8x8xf32, #tpu.memory_space<vmem>>, vector<8x8xf32>,
    } else {
    }
    %c0 = arith.constant 0 : index
    %c0_1 = arith.constant 0 : index
    %c0_2 = arith.constant 0 : index
    %c0_3 = arith.constant 0 : index
    %3 = vector.load %arg4[%c0, %c0_1, %c0_2, %c0_3] : memref<1x1x8x8xf32, #tpu.memory_space<vmem>>, vector<1x1x8x8xf32>
    %4 = vector.shape_cast %3 : vector<1x1x8x8xf32> to vector<8x8xf32>
    %c0_4 = arith.constant 0 : index
    %c0_5 = arith.constant 0 : index
    %c0_6 = arith.constant 0 : index
    %c0_7 = arith.constant 0 : index
    %5 = vector.load %arg5[%c0_4, %c0_5, %c0_6, %c0_7] : memref<1x1x8x8xf32, #tpu.memory_space<vmem>>, vector<1x1x8x8xf32>
    %6 = vector.shape_cast %5 : vector<1x1x8x8xf32> to vector<8x8xf32>
    %c0_8 = arith.constant 0 : index
    %c0_9 = arith.constant 0 : index
    %c0_10 = arith.constant 0 : index
    %c0_11 = arith.constant 0 : index
    %7 = vector.load %arg6[%c0_8, %c0_9, %c0_10, %c0_11] : memref<1x1x8x8xf32, #tpu.memory_space<vmem>>, vector<1x1x8x8xf32>
    %8 = vector.shape_cast %7 : vector<1x1x8x8xf32> to vector<8x8xf32>
    %cst = arith.constant dense<0.000000e+00> : vector<8x8xf32>
    %9 = tpu.matmul %4, %6, %cst {dimension_numbers = #tpu.dot_dimension_numbers<[1], [1], [0], [0], [0, 0, 1, 0], [], []>} : vector<8x8xf32>, vector<8x8xf32>, vector<8x8xf32> -> vector<8x8xf32>
    %cst_12 = arith.constant 0.353553385 : f32
    %10 = vector.broadcast %cst_12 : f32 to vector<8x8xf32>
    %11 = arith.mulf %9, %10 : vector<8x8xf32>
    %c0_13 = arith.constant 0 : index
    %c0_14 = arith.constant 0 : index
    %12 = vector.load %arg8[%c0_13, %c0_14] : memref<8x1xf32, #tpu.memory_space<vmem>>, vector<8x1xf32>
    %cst_15 = arith.constant dense<0xFF800000> : vector<8xf32>
    %13 = vector.multi_reduction <maximumf>, %11, %cst_15 [1] : vector<8x8xf32> to vector<8xf32>
    %14 = vector.shape_cast %13 : vector<8xf32> to vector<8x1xf32>
    %15 = arith.maximumf %12, %14 : vector<8x1xf32>
    %16 = arith.subf %12, %15 : vector<8x1xf32>
    %17 = math.exp %16 : vector<8x1xf32>
    %18 = vector.broadcast %15 : vector<8x1xf32> to vector<8x8xf32>
    %19 = arith.subf %11, %18 : vector<8x8xf32>
    %20 = math.exp %19 : vector<8x8xf32>
    %c0_16 = arith.constant 0 : index
    %c0_17 = arith.constant 0 : index
    %21 = vector.load %arg9[%c0_16, %c0_17] : memref<8x1xf32, #tpu.memory_space<vmem>>, vector<8x1xf32>
    %22 = arith.mulf %17, %21 : vector<8x1xf32>
    %cst_18 = arith.constant dense<0.000000e+00> : vector<8xf32>
    %23 = vector.multi_reduction <add>, %20, %cst_18 [1] : vector<8x8xf32> to vector<8xf32>
    %24 = vector.shape_cast %23 : vector<8xf32> to vector<8x1xf32>
    %25 = arith.addf %22, %24 : vector<8x1xf32>
    %c0_19 = arith.constant 0 : index
    %c0_20 = arith.constant 0 : index
    %26 = vector.load %arg9[%c0_19, %c0_20] : memref<8x1xf32, #tpu.memory_space<vmem>>, vector<8x1xf32>
    tpu.vector_store %arg9[%c0_19, %c0_20], %25 {strides = array<i32>} : memref<8x1xf32, #tpu.memory_space<vmem>>, vector<8x1xf32>,
    %c0_21 = arith.constant 0 : index
    %c0_22 = arith.constant 0 : index
    %27 = vector.load %arg10[%c0_21, %c0_22] : memref<8x8xf32, #tpu.memory_space<vmem>>, vector<8x8xf32>
    %28 = vector.broadcast %17 : vector<8x1xf32> to vector<8x8xf32>
    %29 = arith.mulf %28, %27 : vector<8x8xf32>
    %cst_23 = arith.constant dense<0.000000e+00> : vector<8x8xf32>
    %30 = tpu.matmul %20, %8, %cst_23 {dimension_numbers = #tpu.dot_dimension_numbers<[1], [0], [0], [1], [0, 0, 1, 1], [], []>} : vector<8x8xf32>, vector<8x8xf32>, vector<8x8xf32> -> vector<8x8xf32>
    %31 = arith.addf %29, %30 : vector<8x8xf32>
    %c0_24 = arith.constant 0 : index
    %c0_25 = arith.constant 0 : index
    %32 = vector.load %arg10[%c0_24, %c0_25] : memref<8x8xf32, #tpu.memory_space<vmem>>, vector<8x8xf32>
    tpu.vector_store %arg10[%c0_24, %c0_25], %31 {strides = array<i32>} : memref<8x8xf32, #tpu.memory_space<vmem>>, vector<8x8xf32>,
    %c0_26 = arith.constant 0 : index
    %c0_27 = arith.constant 0 : index
    %33 = vector.load %arg8[%c0_26, %c0_27] : memref<8x1xf32, #tpu.memory_space<vmem>>, vector<8x1xf32>
    tpu.vector_store %arg8[%c0_26, %c0_27], %15 {strides = array<i32>} : memref<8x1xf32, #tpu.memory_space<vmem>>, vector<8x1xf32>,
    %c0_i32_28 = arith.constant 0 : i32
    %34 = arith.cmpi eq, %arg3, %c0_i32_28 : i32
    %35 = arith.extui %34 : i1 to i32
    %c0_i32_29 = arith.constant 0 : i32
    %36 = arith.cmpi ne, %35, %c0_i32_29 : i32
    scf.if %36 {
      %c0_30 = arith.constant 0 : index
      %c0_31 = arith.constant 0 : index
      %37 = vector.load %arg9[%c0_30, %c0_31] : memref<8x1xf32, #tpu.memory_space<vmem>>, vector<8x1xf32>
      %38 = tpu.reciprocal %37 {approx = true} : vector<8x1xf32> -> vector<8x1xf32>
      %c0_32 = arith.constant 0 : index
      %c0_33 = arith.constant 0 : index
      %39 = vector.load %arg10[%c0_32, %c0_33] : memref<8x8xf32, #tpu.memory_space<vmem>>, vector<8x8xf32>
      %40 = vector.broadcast %38 : vector<8x1xf32> to vector<8x8xf32>
      %41 = arith.mulf %39, %40 : vector<8x8xf32>
      %c0_34 = arith.constant 0 : index
      %c0_35 = arith.constant 0 : index
      %c0_36 = arith.constant 0 : index
      %c0_37 = arith.constant 0 : index
      %42 = vector.load %arg7[%c0_34, %c0_35, %c0_36, %c0_37] : memref<1x1x8x8xf32, #tpu.memory_space<vmem>>, vector<1x1x8x8xf32>
      %43 = vector.shape_cast %42 : vector<1x1x8x8xf32> to vector<8x8xf32>
      %44 = vector.shape_cast %41 : vector<8x8xf32> to vector<1x1x8x8xf32>
      tpu.vector_store %arg7[%c0_34, %c0_35, %c0_36, %c0_37], %44 {strides = array<i32>} : memref<1x1x8x8xf32, #tpu.memory_space<vmem>>, vector<1x1x8x8xf32>,
    } else {
    }
    return
  }
  func.func @transform_0(%arg0: i32, %arg1: i32, %arg2: i32, %arg3: i32) -> (i32, i32, i32, i32) {
    %c0_i32 = arith.constant 0 : i32
    %c0_i32_0 = arith.constant 0 : i32
    return %arg0, %arg1, %arg2, %c0_i32 : i32, i32, i32, i32
  }
  func.func @transform_1(%arg0: i32, %arg1: i32, %arg2: i32, %arg3: i32) -> (i32, i32, i32, i32) {
    %c0_i32 = arith.constant 0 : i32
    %c0_i32_0 = arith.constant 0 : i32
    return %arg0, %arg1, %arg3, %c0_i32 : i32, i32, i32, i32
  }
  func.func @transform_2(%arg0: i32, %arg1: i32, %arg2: i32, %arg3: i32) -> (i32, i32, i32, i32) {
    %c0_i32 = arith.constant 0 : i32
    %c0_i32_0 = arith.constant 0 : i32
    return %arg0, %arg1, %arg3, %c0_i32 : i32, i32, i32, i32
  }
  func.func @transform_3(%arg0: i32, %arg1: i32, %arg2: i32, %arg3: i32) -> (i32, i32, i32, i32) {
    %c0_i32 = arith.constant 0 : i32
    %c0_i32_0 = arith.constant 0 : i32
    return %arg0, %arg1, %arg2, %c0_i32 : i32, i32, i32, i32
  }
}

module attributes {stable_mosaic.version = 11 : i64} {
  func.func @_linear_kernel(%arg0: i32, %arg1: i32, %arg2: i32, %arg3: memref<16x32xf32, #tpu.memory_space<vmem>>, %arg4: memref<32x32xf32, #tpu.memory_space<vmem>>, %arg5: memref<1x32xf32, #tpu.memory_space<vmem>>, %arg6: memref<16x32xf32, #tpu.memory_space<vmem>>, %arg7: memref<16x32xf32, #tpu.memory_space<vmem>>) attributes {dimension_semantics = [#tpu.dimension_semantics<parallel>, #tpu.dimension_semantics<parallel>, #tpu.dimension_semantics<arbitrary>], iteration_bounds = array<i64: 1, 1, 1>, scalar_prefetch = 0 : i64, scratch_operands = 1 : i64, tpu.core_type = #tpu.core_type<tc>, window_params = [{transform_indices = @transform_0, window_bounds = array<i64: 16, 32>}, {transform_indices = @transform_1, window_bounds = array<i64: 32, 32>}, {transform_indices = @transform_2, window_bounds = array<i64: 1, 32>}, {transform_indices = @transform_3, window_bounds = array<i64: 16, 32>}]} {
    %c0_i32 = arith.constant 0 : i32
    %0 = arith.cmpi eq, %arg2, %c0_i32 : i32
    %1 = arith.extui %0 : i1 to i32
    %c0_i32_0 = arith.constant 0 : i32
    %2 = arith.cmpi ne, %1, %c0_i32_0 : i32
    scf.if %2 {
      %cst_10 = arith.constant 0.000000e+00 : f32
      %12 = vector.broadcast %cst_10 : f32 to vector<16x32xf32>
      %c0_11 = arith.constant 0 : index
      %c0_12 = arith.constant 0 : index
      %13 = vector.load %arg7[%c0_11, %c0_12] : memref<16x32xf32, #tpu.memory_space<vmem>>, vector<16x32xf32>
      tpu.vector_store %arg7[%c0_11, %c0_12], %12 {strides = array<i32>} : memref<16x32xf32, #tpu.memory_space<vmem>>, vector<16x32xf32>,
    } else {
    }
    %c0 = arith.constant 0 : index
    %c0_1 = arith.constant 0 : index
    %3 = vector.load %arg7[%c0, %c0_1] : memref<16x32xf32, #tpu.memory_space<vmem>>, vector<16x32xf32>
    %c0_2 = arith.constant 0 : index
    %c0_3 = arith.constant 0 : index
    %4 = vector.load %arg3[%c0_2, %c0_3] : memref<16x32xf32, #tpu.memory_space<vmem>>, vector<16x32xf32>
    %c0_4 = arith.constant 0 : index
    %c0_5 = arith.constant 0 : index
    %5 = vector.load %arg4[%c0_4, %c0_5] : memref<32x32xf32, #tpu.memory_space<vmem>>, vector<32x32xf32>
    %cst = arith.constant dense<0.000000e+00> : vector<16x32xf32>
    %6 = tpu.matmul %4, %5, %cst {dimension_numbers = #tpu.dot_dimension_numbers<[1], [0], [0], [1], [0, 0, 1, 1], [], []>} : vector<16x32xf32>, vector<32x32xf32>, vector<16x32xf32> -> vector<16x32xf32>
    %7 = arith.addf %3, %6 : vector<16x32xf32>
    %c0_6 = arith.constant 0 : index
    %c0_7 = arith.constant 0 : index
    %8 = vector.load %arg7[%c0_6, %c0_7] : memref<16x32xf32, #tpu.memory_space<vmem>>, vector<16x32xf32>
    tpu.vector_store %arg7[%c0_6, %c0_7], %7 {strides = array<i32>} : memref<16x32xf32, #tpu.memory_space<vmem>>, vector<16x32xf32>,
    %c0_i32_8 = arith.constant 0 : i32
    %9 = arith.cmpi eq, %arg2, %c0_i32_8 : i32
    %10 = arith.extui %9 : i1 to i32
    %c0_i32_9 = arith.constant 0 : i32
    %11 = arith.cmpi ne, %10, %c0_i32_9 : i32
    scf.if %11 {
      %c0_10 = arith.constant 0 : index
      %c0_11 = arith.constant 0 : index
      %12 = vector.load %arg7[%c0_10, %c0_11] : memref<16x32xf32, #tpu.memory_space<vmem>>, vector<16x32xf32>
      %c0_12 = arith.constant 0 : index
      %c0_13 = arith.constant 0 : index
      %13 = vector.load %arg5[%c0_12, %c0_13] : memref<1x32xf32, #tpu.memory_space<vmem>>, vector<1x32xf32>
      %14 = vector.broadcast %13 : vector<1x32xf32> to vector<16x32xf32>
      %15 = arith.addf %12, %14 : vector<16x32xf32>
      %c0_14 = arith.constant 0 : index
      %c0_15 = arith.constant 0 : index
      %16 = vector.load %arg6[%c0_14, %c0_15] : memref<16x32xf32, #tpu.memory_space<vmem>>, vector<16x32xf32>
      tpu.vector_store %arg6[%c0_14, %c0_15], %15 {strides = array<i32>} : memref<16x32xf32, #tpu.memory_space<vmem>>, vector<16x32xf32>,
    } else {
    }
    return
  }
  func.func @transform_0(%arg0: i32, %arg1: i32, %arg2: i32) -> (i32, i32) {
    %c0_i32 = arith.constant 0 : i32
    return %arg0, %arg2 : i32, i32
  }
  func.func @transform_1(%arg0: i32, %arg1: i32, %arg2: i32) -> (i32, i32) {
    %c0_i32 = arith.constant 0 : i32
    return %arg2, %arg1 : i32, i32
  }
  func.func @transform_2(%arg0: i32, %arg1: i32, %arg2: i32) -> (i32, i32) {
    %c0_i32 = arith.constant 0 : i32
    %c0_i32_0 = arith.constant 0 : i32
    return %c0_i32, %arg1 : i32, i32
  }
  func.func @transform_3(%arg0: i32, %arg1: i32, %arg2: i32) -> (i32, i32) {
    %c0_i32 = arith.constant 0 : i32
    return %arg0, %arg1 : i32, i32
  }
}

</mosaic_0001>

<bundles_post_ra>
// kernel: multi_head_attention.3
= control target key start
LH: loop header
LB: loop body
LE: loop exit
PB: predicated region body
PF: predicated region fallthrough
CT: control target
= control target key end

     0   :  { %vm29_vm0 = vcmask 261120   ;;  %vm18_vm1 = vcmask 785408   ;;  %v165_v3 = vmov 0.0   ;;  %s221_s1 = inlined_call_operand.vmem [shape: f32[32,96], index: 1, kind: input, shape index: {}]   ;;  %s222_s0 = inlined_call_operand.vmem [shape: f32[16,32], index: 0, kind: input, shape index: {}]   ;;  %s223_s2 = inlined_call_operand.vmem [shape: f32[1,96], index: 2, kind: input, shape index: {}]   ;;  %s224_s3 = inlined_call_operand.vmem [shape: f32[16,96], index: 3, kind: output, shape index: {}]  }
   0x1   :  { %v25_v0 = vld [vmem:[%s221_s1] sm:$0xff]  ;;  %v26_v1 = vld [vmem:[%s221_s1 + $0x8] sm:$0xff]  ;;  %v27_v2 = vld [vmem:[%s221_s1 + $0x10] sm:$0xff]  ;;  %20 = vst.msk [vmem:[#allocation2 + $0x8] sm:$0xff] %vm18_vm1, %v165_v3 }
   0x2   :  { %19 = vst.msk [vmem:[#allocation2] sm:$0xff] %vm18_vm1, %v165_v3  ;;  %v156_v4 = vpack.c.bf16 %v26_v1, %v25_v0  ;;  %v28_v5 = vld [vmem:[%s221_s1 + $0x18] sm:$0xff]  ;;  %v23_v6 = vld [vmem:[%s222_s0] sm:$0xff]  ;;  %v24_v8 = vld [vmem:[%s222_s0 + $0x8] sm:$0xff] }
   0x3   :  { %v160_v7 = vpack.c.bf16 %v28_v5, %v27_v2  ;;  %153 = vmatprep.mubr.msk.f32.mxu0 %vm29_vm0, %v23_v6  ;;  %v138_v15 = vld [vmem:[%s223_s2] ss:$0 sm:$0xff] }
   0x4   :  { %157 = vmatprep.subr.bf16.mxu0 %v156_v4 }
   0x5   :  { %159 = vmatpush3.bf16.msra.mxu0 %v156_v4 }
   0x6   :  { %161 = vmatprep.subr.bf16.mxu0 %v160_v7 }
   0x8   :  { %v22_v9 = vld [vmem:[#allocation2 + $0x8] sm:$0xff] }
   0x9   :  { %163 = vmatpush3.bf16.msra.mxu0 %v160_v7  ;;  %v21_v10 = vld [vmem:[#allocation2] sm:$0xff] }
   0xc   :  { %154 = vmatmul.mubr.msk.f32.vlgmr.msra.gmra.mrb[0].mxu0 %vm29_vm0, %v24_v8 }
  0xdf   :  { %v155_v11 = vpop.f32.mrb[0].mxu0 }
  0xe0   :  { %v112_v12 = vadd.f32 %v155_v11, %v22_v9  ;;  %v102_v13 = vpop.f32.mrb[1].mxu0 }
  0xe1   :  { %v111_v14 = vadd.f32 %v102_v13, %v21_v10 }
  0xe2   :  { %115 = vst.msk [vmem:[#allocation2 + $0x8] sm:$0xff] %vm18_vm1, %v112_v12 }
  0xe3   :  { %114 = vst.msk [vmem:[#allocation2] sm:$0xff] %vm18_vm1, %v111_v14 }
  0xe9   :  { %v120_v16 = vld [vmem:[#allocation2 + $0x8] sm:$0xff] }
  0xea   :  { %v129_v17 = vadd.f32 %v138_v15, %v120_v16  ;;  %v119_v18 = vld [vmem:[#allocation2] sm:$0xff] }
  0xeb   :  { %v128_v19 = vadd.f32 %v138_v15, %v119_v18 }
  0xec   :  { %131 = vst.msk [vmem:[%s224_s3 + $0x8] sm:$0xff] %vm18_vm1, %v129_v17 }
  0xed   :  { %130 = vst.msk [vmem:[%s224_s3] sm:$0xff] %vm18_vm1, %v128_v19 }

// kernel: multi_head_attention.4
= control target key start
LH: loop header
LB: loop body
LE: loop exit
PB: predicated region body
PF: predicated region fallthrough
CT: control target
= control target key end

     0   :  { %s824_s12 = smov 0   ;;  %s826_s13 = smov 0   ;;  %s899_s0 = inlined_call_operand.vmem [shape: f32[2,4,8,8], index: 0, kind: input, shape index: {}]   ;;  %s900_s1 = inlined_call_operand.vmem [shape: f32[2,4,8,8], index: 1, kind: input, shape index: {}]   ;;  %s901_s2 = inlined_call_operand.vmem [shape: f32[2,4,8,8], index: 2, kind: input, shape index: {}]   ;;  %s902_s3 = inlined_call_operand.vmem [shape: f32[2,4,8,8], index: 3, kind: output, shape index: {}]  }
   0x1   :  { %s828_s14 = smov 0   ;;  %s830_s15 = smov 0  }
   0x2   :  { %s832_s16 = smov 0  }
   0x3 LB: > { %s35_s17 = sadd.s32 1, %s790_s14  ;;  %s39_s18 = sadd.s32 1, %s794_s15  ;;  %s798_s16 = sphi %s832_s16, %s13_s16   ;;  %s794_s15 = sphi %s830_s15, %s906_s15   ;;  %s790_s14 = sphi %s828_s14, %s905_s14   ;;  %s786_s13 = sphi %s826_s13, %s904_s13   ;;  %s782_s12 = sphi %s824_s12, %s903_s12  }
   0x4   : > { %p37_p0 = scmp.ge.s32.totalorder %s35_s17, 4  ;;  %p680_p1 = scmp.ge.s32.totalorder %s798_s16, 1 }
   0x5   : > { %p217_p2 = scmp.lt.s32.totalorder %s798_s16, 9 }
   0x6   : > { %s908_s17 = smov (%p37_p0, %s35_s17), 0  ;;  %s910_s18 = smov (!%p37_p0, %s39_s18), %s794_s15 }
   0x7   : > { %p218_p3 = pnand %p680_p1, %p217_p2  ;;  %p41_p4 = scmp.ge.s32.totalorder %s910_s18, 2 }
   0x8   : > { %p275_p5 = scmp.lt.s32.totalorder (!%p218_p3), %s786_s13, 1  ;;  %p277_p6 = scmp.lt.s32.totalorder (!%p218_p3), %s782_s12, 3  ;;  %vm326_vm0 = vcmask (!%p218_p3), 64512   ;;  %v800_v0 = vmov (!%p218_p3), 0.0   ;;  %vm801_vm1 = vmmov (!%p218_p3), 0   ;;  %vm323_vm2 = vcmask (!%p218_p3), 7168  }
   0x9   : > { %s912_s18 = smov (%p41_p4, %s910_s18), 0  ;;  %221 = sbr.rel (%p218_p3) target bundleno = 822 (0x336), region = 32 }
   0xa   : > { %698 = vmatprep.subr.mxu0 (!%p218_p3), %v800_v0  ;;  %327 = vst.msk [vmem:[#allocation4] sm:$0xff] (!%p218_p3), %vm326_vm0, %v800_v0  ;;  %700 = vmatprep.mubr.msk.f32.mxu0 (!%p218_p3), %vm801_vm1, %v800_v0  ;;  %v802_v3 = vmov (!%p218_p3), -inf   ;;  %v803_v8 = vmov (!%p218_p3), 0  }
   0xb   : > { %703 = vmatprep.subr.mxu1 (!%p218_p3), %v800_v0  ;;  %705 = vmatprep.mubr.msk.f32.mxu1 (!%p218_p3), %vm801_vm1, %v800_v0  ;;  %324 = vst.msk [vmem:[#allocation2] sm:$0xff] (!%p218_p3), %vm323_vm2, %v802_v3  ;;  %325 = vst.msk [vmem:[#allocation3] sm:$0xff] (!%p218_p3), %vm323_vm2, %v800_v0 }
   0xc   : > { %752 = vset.pattern.permute.xlu0 (!%p218_p3), %v803_v8  ;;  %753 = vset.pattern.permute.xlu1 (!%p218_p3), %v803_v8 }
  0x10   : > { %s914_s13 = smov (!%p275_p5, %s786_s13), 1  ;;  %s916_s12 = smov (!%p277_p6, %s782_s12), 3 }
  0x11   : > { %s681_s19 = sshll.u32 %s914_s13, 2  ;;  %v433_v27 = vld [vmem:[#allocation4] sm:$0xff] }
  0x12   : > { %s283_s20 = sadd.s32 %s681_s19, %s916_s12  ;;  %v409_v9 = vld [vmem:[#allocation2] sm:$0xff]  ;;  %v425_v21 = vld [vmem:[#allocation3] sm:$0xff] }
  0x13   : > { %s855_s21 = sshll.u32 %s283_s20, 3 }
  0x14   : > { %s296_s24 = scalar_lea.vmem %s900_s1, %s855_s21  ;;  %s285_s27 = scalar_lea.vmem %s899_s0, %s855_s21 }
  0x15   : > { %v329_v1 = vld [vmem:[%s296_s24] sm:$0xff]  ;;  %s307_s30 = scalar_lea.vmem %s901_s2, %s855_s21  ;;  %s318_s6 = scalar_lea.vmem %s902_s3, %s855_s21 }
  0x16   : > { %699 = vmatpush3.xpose.msk.msra.mxu0 %vm326_vm0, %v329_v1  ;;  %v328_v2 = vld [vmem:[%s285_s27] sm:$0xff] }
  0x17   : > { %v330_v13 = vld [vmem:[%s307_s30] sm:$0xff] }
  0x18   : > { %704 = vmatpush3.msra.mxu1 %v330_v13 }
  0x19   : > { %701 = vmatmul.mubr.msk.f32.vlgmr.msra.gmra.mrb[0].mxu0 %vm326_vm0, %v328_v2 }
  0xec   : > { %v404_v4 = vpop.f32.mrb[0].mxu0 }
  0xed   : > { %v408_v5 = vmul.f32 0.35355338, %v404_v4  ;;  %v702_v6 = vpop.f32.mrb[1].mxu0 }
  0xef   : > { %v410_v7 = vsel %vm326_vm0, %v408_v5, -inf }
  0xf0   : > { %411 = vmax.xlane.f32.xlu0 %v410_v7 }
 0x17d   : > { %v412_v10 = vpop.xlane.xlu0 %411 }
 0x17e   : > { %v413_v11 = vmax.f32 %v409_v9, %v412_v10 }
 0x180   : > { %v414_v12 = vsub.f32 %v409_v9, %v413_v11  ;;  %515 = vst.msk [vmem:[#allocation2] sm:$0xff] %vm323_vm2, %v413_v11  ;;  %419 = vperm.xlu0 %752, %v413_v11  }
 0x182   : > { %v415_v19 = vmul.f32 1.442695, %v414_v12 }
 0x1ff   : > { %v420_v14 = vpop.permute.xlu0 %419 }
 0x200   : > { %v422_v15 = vsub.f32 %v408_v5, %v420_v14 }
 0x202   : > { %v423_v16 = vmul.f32 1.442695, %v422_v15 }
 0x204   : > { %754 = vpow2.f32 %v423_v16 }
 0x205   : > { %756 = vpow2.f32 %v415_v19 }
 0x20e   : > { %v755_v17 = vpop.eup %754 }
 0x20f   : > { %706 = vmatmul.mubr.msk.f32.vlgmr.msra.gmra.mrb[0].mxu1 %vm326_vm0, %v755_v17  ;;  %v427_v18 = vsel %vm326_vm0, %v755_v17, 0.0  ;;  %v757_v20 = vpop.eup %756 }
 0x210   : > { %428 = vadd.xlane.f32.xlu1 %v427_v18  ;;  %v426_v22 = vmul.f32 %v757_v20, %v425_v21 }
 0x221   : > { %436 = vperm.xlu1 %753, %v757_v20  }
 0x29d   : > { %v429_v23 = vpop.xlane.xlu1 %428 }
 0x29e   : > { %v430_v24 = vadd.f32 %v429_v23, %v426_v22 }
 0x2a0   : > { %432 = vst.msk [vmem:[#allocation3] sm:$0xff] %vm323_vm2, %v430_v24 }
 0x2a1   : > { %v437_v28 = vpop.permute.xlu1 %436 }
 0x2a2   : > { %v439_v29 = vmul.f32 %v437_v28, %v433_v27 }
 0x2a7   : > { %v519_v25 = vld [vmem:[#allocation3] sm:$0xff] }
 0x2a8   : > { %758 = vrcp.f32 %v519_v25 }
 0x2b2   : > { %v759_v26 = vpop.eup %758 }
 0x2b3   : > { %524 = vperm.xlu1 %753, %v759_v26  }
 0x2e2   : > { %v509_v30 = vpop.f32.mrb[0].mxu1 }
 0x2e3   : > { %v513_v31 = vadd.f32 %v509_v30, %v439_v29  ;;  %v707_v32 = vpop.f32.mrb[1].mxu1 }
 0x2e5   : > { %514 = vst.msk [vmem:[#allocation4] sm:$0xff] %vm326_vm0, %v513_v31 }
 0x2ec   : > { %v521_v33 = vld [vmem:[#allocation4] sm:$0xff] }
 0x332   : > { %v525_v34 = vpop.permute.xlu1 %524 }
 0x333   : > { %v527_v35 = vmul.f32 %v525_v34, %v521_v33 }
 0x335   : > { %528 = vst.msk [vmem:[%s318_s6] sm:$0xff] %vm326_vm0, %v527_v35 }
 0x336 PF: > { %s13_s16 = sadd.s32 1, %s798_s16   ;;  %s903_s12 = smov %s790_s14 }
 0x337   : > { %p10_p7 = scmp.ge.s32.totalorder %s13_s16, 10   ;;  %s904_s13 = smov %s794_s15 }
 0x338   : > { %s905_s14 = smov %s908_s17  ;;  %s906_s15 = smov %s912_s18 }
 0x339   :  { %12 = sbr.rel (!%p10_p7) target bundleno = 3 (0x3), region = 76 }

// kernel: multi_head_attention.5
= control target key start
LH: loop header
LB: loop body
LE: loop exit
PB: predicated region body
PF: predicated region fallthrough
CT: control target
= control target key end

     0   :  { %vm19_vm0 = vcmask 261120   ;;  %v204_v6 = vmov 0.0   ;;  %s269_s0 = inlined_call_operand.vmem [shape: f32[16,32], index: 0, kind: input, shape index: {}]   ;;  %s270_s1 = inlined_call_operand.vmem [shape: f32[32,32], index: 1, kind: input, shape index: {}]   ;;  %s271_s2 = inlined_call_operand.vmem [shape: f32[1,32], index: 2, kind: input, shape index: {}]   ;;  %s272_s3 = inlined_call_operand.hbm [shape: f32[16,32], index: 3, kind: output, shape index: {}]  }
   0x1   :  { %v26_v0 = vld [vmem:[%s270_s1] sm:$0xff]  ;;  %v27_v1 = vld [vmem:[%s270_s1 + $0x8] sm:$0xff]  ;;  %v28_v2 = vld [vmem:[%s270_s1 + $0x10] sm:$0xff]  ;;  %21 = vst.msk [vmem:[#allocation2 + $0x8] sm:$0xff] %vm19_vm0, %v204_v6 }
   0x2   :  { %v168_v3 = vpack.c.bf16 %v27_v1, %v26_v0  ;;  %v29_v4 = vld [vmem:[%s270_s1 + $0x18] sm:$0xff]  ;;  %v24_v5 = vld [vmem:[%s269_s0] sm:$0xff]  ;;  %20 = vst.msk [vmem:[#allocation2] sm:$0xff] %vm19_vm0, %v204_v6 }
   0x3   :  { %v172_v7 = vpack.c.bf16 %v29_v4, %v28_v2  ;;  %165 = vmatprep.mubr.msk.f32.mxu0 %vm19_vm0, %v24_v5 }
   0x4   :  { %8 = vsyncpa [#allocation4], 0  ;;  %169 = vmatprep.subr.bf16.mxu0 %v168_v3  ;;  %v25_v8 = vld [vmem:[%s269_s0 + $0x8] sm:$0xff]  ;;  %v150_v15 = vld [vmem:[%s271_s2] ss:$0 sm:$0xff]  ;;  %s205_s25 = smov [#allocation3]  }
   0x5   :  { %171 = vmatpush3.bf16.msra.mxu0 %v168_v3  ;;  %s137_s26 = sshll.u32 %s205_s25, 4  ;;  %s138_s26 = int_to_ptr.vmem [resolvable:$true] %s137_s26 }
   0x6   :  { %173 = vmatprep.subr.bf16.mxu0 %v172_v7  ;;  %s180_s0 = scalar_lea.vmem %s138_s26, 256  ;;  %p185_p1 = scmp.lt.s32.totalorder %s138_s26, %s138_s26 }
   0x7   :  { %p181_p0 = scmp.ne.s32.totalorder %s138_s26, %s180_s0  ;;  %p186_p2 = scmp.lt.s32.totalorder %s180_s0, %s180_s0 }
   0x8   :  { %v23_v9 = vld [vmem:[#allocation2 + $0x8] sm:$0xff] }
   0x9   :  { %175 = vmatpush3.bf16.msra.mxu0 %v172_v7  ;;  %v22_v10 = vld [vmem:[#allocation2] sm:$0xff]  ;;  %p187_p3 = por %p186_p2, %p185_p1 }
   0xb   :  { %p188_p4 = pnand %p187_p3, %p181_p0 }
   0xc   :  { %166 = vmatmul.mubr.msk.f32.vlgmr.msra.gmra.mrb[0].mxu0 %vm19_vm0, %v25_v8 }
  0xdf   :  { %v167_v11 = vpop.f32.mrb[0].mxu0 }
  0xe0   :  { %v113_v12 = vadd.f32 %v167_v11, %v23_v9  ;;  %v103_v13 = vpop.f32.mrb[1].mxu0 }
  0xe1   :  { %v112_v14 = vadd.f32 %v103_v13, %v22_v10 }
  0xe2   :  { %115 = vst.msk [vmem:[#allocation2 + $0x8] sm:$0xff] %vm19_vm0, %v113_v12 }
  0xe3   :  { %114 = vst.msk [vmem:[#allocation2] sm:$0xff] %vm19_vm0, %v112_v14 }
  0xe9   :  { %v120_v16 = vld [vmem:[#allocation2 + $0x8] sm:$0xff] }
  0xea   :  { %v119_v17 = vld [vmem:[#allocation2] sm:$0xff]  ;;  %v129_v18 = vadd.f32 %v150_v15, %v120_v16 }
  0xeb   :  { %v128_v19 = vadd.f32 %v150_v15, %v119_v17 }
  0xec   :  { %131 = vst.msk [vmem:[#allocation3 + $0x8] sm:$0xff] %vm19_vm0, %v129_v18 }
  0xed   :  { %130 = vst.msk [vmem:[#allocation3] sm:$0xff] %vm19_vm0, %v128_v19 }
  0xee   :  { %191 = shalt.err (!%p188_p4)
}
  0xef   :  { %s192_s28 = scalar_lea.hbm %s272_s3, 256 }
  0xf0   :  { %p193_p5 = scmp.ne.s32.totalorder %s272_s3, %s192_s28  ;;  %p196_p6 = scmp.lt.u32.totalorder %s192_s28, %s272_s3 }
  0xf2   :  { %p198_p7 = pnand %p196_p6, %p193_p5 }
  0xf4   :  { %201 = shalt.err (!%p198_p7)
}
  0xf5   :  { %s206_s6 = smov 128   ;;  %s207_s7 = smov 8  }
  0xf6   :  { %143 = dma.vmem_to_hbm [thread:$0]  %s138_s26, 256, %s272_s3, [#allocation4], %s206_s6, %s206_s6, %s207_s7  }
  0xf7   :  { %202 = dma.done.wait [#allocation4], 256  }
  0xf8   :  { %203 = vsyncadd [#allocation4], 4294967040 }
  0xf9   :  { %147 = vsyncpa [#allocation4], 1 }

</bundles_post_ra>
